<compile_context>
chip_gen: v7x
topology: tpu7x:2x2x1
jax: 0.10.0
libtpu: 0.0.40
codegen_flags: <defaults>
</compile_context>

<pallas_src>
import functools

import jax
import jax.numpy as jnp
from jax.experimental import pallas as pl
from jax.experimental.pallas import tpu as pltpu

_SUBLANE = 8  # f32 sublane packing; bf16 packs 2 rows/sublane -> use 16


def _round_up(x, m):
    return ((x + m - 1) // m) * m


def _mlp_kernel(x_ref, w0_ref, b0_ref, w1_ref, b1_ref, w2_ref, b2_ref, o_ref):
    """Whole 3-layer MLP hot path (matmuls + bias + ReLU) on one batch tile.

    All matmuls accumulate in f32 on the MXU; biases are f32 and added to the
    f32 accumulator; intermediate activations are cast to the weight dtype
    (f32 or bf16) before the next matmul. x is cast in-kernel (free on the
    VPU) so the wrapper never touches x in HBM.
    """
    x = x_ref[...].astype(w0_ref.dtype)
    h = jnp.dot(x, w0_ref[...], preferred_element_type=jnp.float32) + b0_ref[...]
    h = jnp.maximum(h, 0.0).astype(w1_ref.dtype)          # ReLU
    h = jnp.dot(h, w1_ref[...], preferred_element_type=jnp.float32) + b1_ref[...]
    h = jnp.maximum(h, 0.0).astype(w2_ref.dtype)          # ReLU
    out = jnp.dot(h, w2_ref[...], preferred_element_type=jnp.float32) + b2_ref[...]
    o_ref[...] = out.astype(o_ref.dtype)                  # final layer: no activation


def prepare_params(params, *, use_bf16=False):
    """One-time (outside the hot jit) weight cast + bias reshape.

    Weights -> compute dtype (f32 or bf16; bf16 is fine on v5e/v6e/v7x MXUs).
    Biases  -> (1, n) float32 (added to the f32 accumulator).
    """
    wdtype = jnp.bfloat16 if use_bf16 else jnp.float32
    out = []
    for w, b in params:
        out.append((jnp.asarray(w, wdtype),
                    jnp.asarray(b, jnp.float32).reshape(1, -1)))
    return tuple(out)


def dynamics_network_forward(x, params, *, batch_tile=1024, min_grid_steps=1,
                             out_dtype=jnp.float32):
    """x: (B, nb_states + nb_actions). params from prepare_params().

    Returns (B, 2*(nb_states+1)) in out_dtype (default f32).
    Ragged B is handled by Pallas boundary masking (no wrapper-side padding).
    On v7x pass min_grid_steps=2 for mid-size batches so the "parallel" batch
    axis uses both TensorCores.
    """
    (w0, b0), (w1, b1), (w2, b2) = params
    B, d_in = x.shape
    h0 = w0.shape[1]
    h1 = w1.shape[1]
    d_out = w2.shape[1]

    # Batch tile: sublane-aligned (16 for packed bf16 weights/activations),
    # no bigger than needed, optionally split so the grid has >= min_grid_steps.
    align = 16 if w0.dtype == jnp.bfloat16 else _SUBLANE
    batch_tile = _round_up(max(batch_tile, align), align)
    min_grid_steps = max(int(min_grid_steps), 1)
    eff_tile = min(batch_tile, _round_up(pl.cdiv(B, min_grid_steps), align))
    grid = (pl.cdiv(B, eff_tile),)

    full = lambda i: (0, 0)  # weights / biases: whole-array resident block

    itemsize = jnp.dtype(x.dtype).itemsize
    w_bytes = sum(int(a.size) * jnp.dtype(a.dtype).itemsize
                  for a in (w0, b0, w1, b1, w2, b2))
    cost = pl.CostEstimate(
        flops=2 * B * (d_in * h0 + h0 * h1 + h1 * d_out),
        transcendentals=0,
        bytes_accessed=B * d_in * itemsize
        + B * d_out * jnp.dtype(out_dtype).itemsize
        + w_bytes,
    )

    return pl.pallas_call(
        _mlp_kernel,
        out_shape=jax.ShapeDtypeStruct((B, d_out), out_dtype),
        grid_spec=pltpu.PrefetchScalarGridSpec(
            num_scalar_prefetch=0,
            grid=grid,
            in_specs=[
                # x tile: last dim == full array dim (unpadded; Mosaic handles
                # the vreg-layout padding in VMEM for free).
                pl.BlockSpec((eff_tile, d_in), lambda i: (i, 0)),
                pl.BlockSpec((d_in, h0), full),   # W0
                pl.BlockSpec((1, h0), full),      # b0
                pl.BlockSpec((h0, h1), full),     # W1
                pl.BlockSpec((1, h1), full),      # b1
                pl.BlockSpec((h1, d_out), full),  # W2
                pl.BlockSpec((1, d_out), full),   # b2
            ],
            # Unpadded output block; ragged last batch block is masked on store.
            out_specs=pl.BlockSpec((eff_tile, d_out), lambda i: (i, 0)),
        ),
        compiler_params=pltpu.CompilerParams(
            dimension_semantics=("parallel",),  # shards batch steps across TCs (v7x)
        ),
        cost_estimate=cost,
    )(x, w0, b0, w1, b1, w2, b2)


def init_params(key, nb_states, nb_actions, hidden_units=(64, 64)):
    """Deterministic synthetic init matching the module's layer shapes."""
    d_in = nb_states + nb_actions
    d_out = 2 * (nb_states + 1)
    dims = [d_in, *hidden_units, d_out]
    params = []
    for i in range(len(dims) - 1):
        key, kw, kb = jax.random.split(key, 3)
        fan_in = dims[i]
        scale = 1.0 / jnp.sqrt(fan_in)
        # stored as (in_features, out_features): already transposed vs torch
        w = jax.random.uniform(kw, (dims[i], dims[i + 1]), jnp.float32, -scale, scale)
        b = jax.random.uniform(kb, (1, dims[i + 1]), jnp.float32, -scale, scale)
        params.append((w, b))
    return params


def reference_forward(x, params):
    (w0, b0), (w1, b1), (w2, b2) = params
    h = jnp.maximum(x @ w0 + b0, 0.0)
    h = jnp.maximum(h @ w1 + b1, 0.0)
    return h @ w2 + b2


if __name__ == "__main__":
    nb_states = 16
    nb_actions = 4
    hidden_units = (64, 64)   # module default
    batch = 256

    key = jax.random.PRNGKey(0)
    key, kx = jax.random.split(key)
    x = jax.random.normal(kx, (batch, nb_states + nb_actions), jnp.float32)
    raw_params = init_params(key, nb_states, nb_actions, hidden_units)
    ref = reference_forward(x, raw_params)

    d_out = 2 * (nb_states + 1)

    # Weights cast / reshaped ONCE outside the hot path.
    params_f32 = prepare_params(raw_params, use_bf16=False)

    # f32 path, multi-step grid (batch_tile=128 -> 2 grid steps).
    fwd = jax.jit(functools.partial(dynamics_network_forward, batch_tile=128))
    out = jax.block_until_ready(fwd(x, params_f32))
    assert out.shape == (batch, d_out)
    assert jnp.allclose(out, ref, atol=1e-4, rtol=1e-4)

    # Ragged batch (not a multiple of 8 / the tile): boundary blocks are masked
    # by the pipeline — no wrapper-side padding or slicing.
    x_ragged = x[:100]
    out_ragged = jax.block_until_ready(
        jax.jit(functools.partial(dynamics_network_forward, batch_tile=1024))(
            x_ragged, params_f32))
    assert out_ragged.shape == (100, d_out)
    assert jnp.allclose(out_ragged, ref[:100], atol=1e-4, rtol=1e-4)

    # bf16 weight storage (f32 MXU accumulation) — valid on v5e/v6e/v7x.
    params_bf16 = prepare_params(raw_params, use_bf16=True)
    out_bf16 = jax.block_until_ready(
        jax.jit(functools.partial(dynamics_network_forward, batch_tile=256))(
            x, params_bf16))
    assert out_bf16.shape == (batch, d_out)
    assert jnp.allclose(out_bf16, ref, atol=5e-2, rtol=5e-2)

    # v7x-style: force >= 2 grid steps so ("parallel",) can use both TCs.
    out_2step = jax.block_until_ready(
        jax.jit(functools.partial(dynamics_network_forward, min_grid_steps=2))(
            x, params_f32))
    assert jnp.allclose(out_2step, ref, atol=1e-4, rtol=1e-4)

    print("KERNEL_OK")
</pallas_src>

<mosaic_0001>
module attributes {stable_mosaic.version = 11 : i64} {
  func.func @_mlp_kernel(%arg0: i32, %arg1: memref<128x20xf32, #tpu.memory_space<vmem>>, %arg2: memref<20x64xf32, #tpu.memory_space<vmem>>, %arg3: memref<1x64xf32, #tpu.memory_space<vmem>>, %arg4: memref<64x64xf32, #tpu.memory_space<vmem>>, %arg5: memref<1x64xf32, #tpu.memory_space<vmem>>, %arg6: memref<64x34xf32, #tpu.memory_space<vmem>>, %arg7: memref<1x34xf32, #tpu.memory_space<vmem>>, %arg8: memref<128x34xf32, #tpu.memory_space<vmem>>) attributes {dimension_semantics = [#tpu.dimension_semantics<parallel>], iteration_bounds = array<i64: 2>, scalar_prefetch = 0 : i64, scratch_operands = 0 : i64, tpu.core_type = #tpu.core_type<tc>, window_params = [{transform_indices = @transform_0, window_bounds = array<i64: 128, 20>}, {pipeline_mode = #tpu.pipeline_mode<synchronous>, transform_indices = @transform_1, window_bounds = array<i64: 20, 64>}, {pipeline_mode = #tpu.pipeline_mode<synchronous>, transform_indices = @transform_2, window_bounds = array<i64: 1, 64>}, {pipeline_mode = #tpu.pipeline_mode<synchronous>, transform_indices = @transform_3, window_bounds = array<i64: 64, 64>}, {pipeline_mode = #tpu.pipeline_mode<synchronous>, transform_indices = @transform_4, window_bounds = array<i64: 1, 64>}, {pipeline_mode = #tpu.pipeline_mode<synchronous>, transform_indices = @transform_5, window_bounds = array<i64: 64, 34>}, {pipeline_mode = #tpu.pipeline_mode<synchronous>, transform_indices = @transform_6, window_bounds = array<i64: 1, 34>}, {transform_indices = @transform_7, window_bounds = array<i64: 128, 34>}]} {
    %c0 = arith.constant 0 : index
    %c0_0 = arith.constant 0 : index
    %0 = vector.load %arg1[%c0, %c0_0] : memref<128x20xf32, #tpu.memory_space<vmem>>, vector<128x20xf32>
    %c0_1 = arith.constant 0 : index
    %c0_2 = arith.constant 0 : index
    %1 = vector.load %arg2[%c0_1, %c0_2] : memref<20x64xf32, #tpu.memory_space<vmem>>, vector<20x64xf32>
    %cst = arith.constant dense<0.000000e+00> : vector<128x64xf32>
    %2 = tpu.matmul %0, %1, %cst {dimension_numbers = #tpu.dot_dimension_numbers<[1], [0], [0], [1], [0, 0, 1, 1], [], []>} : vector<128x20xf32>, vector<20x64xf32>, vector<128x64xf32> -> vector<128x64xf32>
    %c0_3 = arith.constant 0 : index
    %c0_4 = arith.constant 0 : index
    %3 = vector.load %arg3[%c0_3, %c0_4] : memref<1x64xf32, #tpu.memory_space<vmem>>, vector<1x64xf32>
    %4 = vector.broadcast %3 : vector<1x64xf32> to vector<128x64xf32>
    %5 = arith.addf %2, %4 : vector<128x64xf32>
    %cst_5 = arith.constant 0.000000e+00 : f32
    %6 = vector.broadcast %cst_5 : f32 to vector<128x64xf32>
    %7 = arith.maximumf %5, %6 : vector<128x64xf32>
    %c0_6 = arith.constant 0 : index
    %c0_7 = arith.constant 0 : index
    %8 = vector.load %arg4[%c0_6, %c0_7] : memref<64x64xf32, #tpu.memory_space<vmem>>, vector<64x64xf32>
    %cst_8 = arith.constant dense<0.000000e+00> : vector<128x64xf32>
    %9 = tpu.matmul %7, %8, %cst_8 {dimension_numbers = #tpu.dot_dimension_numbers<[1], [0], [0], [1], [0, 0, 1, 1], [], []>} : vector<128x64xf32>, vector<64x64xf32>, vector<128x64xf32> -> vector<128x64xf32>
    %c0_9 = arith.constant 0 : index
    %c0_10 = arith.constant 0 : index
    %10 = vector.load %arg5[%c0_9, %c0_10] : memref<1x64xf32, #tpu.memory_space<vmem>>, vector<1x64xf32>
    %11 = vector.broadcast %10 : vector<1x64xf32> to vector<128x64xf32>
    %12 = arith.addf %9, %11 : vector<128x64xf32>
    %cst_11 = arith.constant 0.000000e+00 : f32
    %13 = vector.broadcast %cst_11 : f32 to vector<128x64xf32>
    %14 = arith.maximumf %12, %13 : vector<128x64xf32>
    %c0_12 = arith.constant 0 : index
    %c0_13 = arith.constant 0 : index
    %15 = vector.load %arg6[%c0_12, %c0_13] : memref<64x34xf32, #tpu.memory_space<vmem>>, vector<64x34xf32>
    %cst_14 = arith.constant dense<0.000000e+00> : vector<128x34xf32>
    %16 = tpu.matmul %14, %15, %cst_14 {dimension_numbers = #tpu.dot_dimension_numbers<[1], [0], [0], [1], [0, 0, 1, 1], [], []>} : vector<128x64xf32>, vector<64x34xf32>, vector<128x34xf32> -> vector<128x34xf32>
    %c0_15 = arith.constant 0 : index
    %c0_16 = arith.constant 0 : index
    %17 = vector.load %arg7[%c0_15, %c0_16] : memref<1x34xf32, #tpu.memory_space<vmem>>, vector<1x34xf32>
    %18 = vector.broadcast %17 : vector<1x34xf32> to vector<128x34xf32>
    %19 = arith.addf %16, %18 : vector<128x34xf32>
    %c0_17 = arith.constant 0 : index
    %c0_18 = arith.constant 0 : index
    %20 = vector.load %arg8[%c0_17, %c0_18] : memref<128x34xf32, #tpu.memory_space<vmem>>, vector<128x34xf32>
    tpu.vector_store %arg8[%c0_17, %c0_18], %19 {strides = array<i32>} : memref<128x34xf32, #tpu.memory_space<vmem>>, vector<128x34xf32>,
    return
  }
  func.func @transform_0(%arg0: i32) -> (i32, i32) {
    %c0_i32 = arith.constant 0 : i32
    %c0_i32_0 = arith.constant 0 : i32
    return %arg0, %c0_i32 : i32, i32
  }
  func.func @transform_1(%arg0: i32) -> (i32, i32) {
    %c0_i32 = arith.constant 0 : i32
    %c0_i32_0 = arith.constant 0 : i32
    %c0_i32_1 = arith.constant 0 : i32
    return %c0_i32, %c0_i32_0 : i32, i32
  }
  func.func @transform_2(%arg0: i32) -> (i32, i32) {
    %c0_i32 = arith.constant 0 : i32
    %c0_i32_0 = arith.constant 0 : i32
    %c0_i32_1 = arith.constant 0 : i32
    return %c0_i32, %c0_i32_0 : i32, i32
  }
  func.func @transform_3(%arg0: i32) -> (i32, i32) {
    %c0_i32 = arith.constant 0 : i32
    %c0_i32_0 = arith.constant 0 : i32
    %c0_i32_1 = arith.constant 0 : i32
    return %c0_i32, %c0_i32_0 : i32, i32
  }
  func.func @transform_4(%arg0: i32) -> (i32, i32) {
    %c0_i32 = arith.constant 0 : i32
    %c0_i32_0 = arith.constant 0 : i32
    %c0_i32_1 = arith.constant 0 : i32
    return %c0_i32, %c0_i32_0 : i32, i32
  }
  func.func @transform_5(%arg0: i32) -> (i32, i32) {
    %c0_i32 = arith.constant 0 : i32
    %c0_i32_0 = arith.constant 0 : i32
    %c0_i32_1 = arith.constant 0 : i32
    return %c0_i32, %c0_i32_0 : i32, i32
  }
  func.func @transform_6(%arg0: i32) -> (i32, i32) {
    %c0_i32 = arith.constant 0 : i32
    %c0_i32_0 = arith.constant 0 : i32
    %c0_i32_1 = arith.constant 0 : i32
    return %c0_i32, %c0_i32_0 : i32, i32
  }
  func.func @transform_7(%arg0: i32) -> (i32, i32) {
    %c0_i32 = arith.constant 0 : i32
    %c0_i32_0 = arith.constant 0 : i32
    return %arg0, %c0_i32 : i32, i32
  }
}

</mosaic_0001>

<bundles_post_ra>
// kernel: dynamics_network_forward.1
= control target key start
LH: loop header
LB: loop body
LE: loop exit
PB: predicated region body
PF: predicated region fallthrough
CT: control target
= control target key end

     0   :  { %s1364_s24 = smov 0   ;;  %s1558_s0 = inlined_call_operand.vmem [shape: f32[256,20], index: 0, kind: input, shape index: {}]   ;;  %s1559_s1 = inlined_call_operand.vmem [shape: f32[20,64], index: 1, kind: input, shape index: {}]   ;;  %s1560_s2 = inlined_call_operand.vmem [shape: f32[1,64], index: 2, kind: input, shape index: {}]   ;;  %s1561_s3 = inlined_call_operand.vmem [shape: f32[64,64], index: 3, kind: input, shape index: {}]   ;;  %s1562_s4 = inlined_call_operand.vmem [shape: f32[1,64], index: 4, kind: input, shape index: {}]   ;;  %s1563_s5 = inlined_call_operand.vmem [shape: f32[64,34], index: 5, kind: input, shape index: {}]   ;;  %s1564_s6 = inlined_call_operand.vmem [shape: f32[1,34], index: 6, kind: input, shape index: {}]   ;;  %s1565_s7 = inlined_call_operand.vmem [shape: f32[256,34], index: 7, kind: output, shape index: {}]  }
   0x1 LB: > { %s1028_s25 = sadd.s32 4294967295, %s1322_s24   ;;  %p1032_p0 = scmp.ge.s32.totalorder %s1322_s24, 1  ;;  %s1322_s24 = sphi %s1364_s24, %s17_s24  }
   0x2   : > { %p238_p1 = scmp.lt.s32.totalorder %s1322_s24, 3 }
   0x4   : > { %p239_p2 = pnand %p1032_p0, %p238_p1 }
   0x5   : > { %v298_v0 = vld [vmem:[%s1559_s1] sm:$0xff] (!%p239_p2)  ;;  %v299_v1 = vld [vmem:[%s1559_s1 + $0x8] sm:$0xff] (!%p239_p2)  ;;  %s1033_s30 = sshll.u32 (!%p239_p2), %s1028_s25, 4  ;;  %v300_v3 = vld [vmem:[%s1559_s1 + $0x10] sm:$0xf] (!%p239_p2)  ;;  %vm357_vm0 = vcmask (!%p239_p2), 1043456  }
   0x6   : > { %242 = sbr.rel (%p239_p2) target bundleno = 698 (0x2ba), region = 48  ;;  %v1268_v2 = vpack.c.bf16 (!%p239_p2), %v299_v1, %v298_v0  ;;  %p271_p3 = scmp.lt.s32.totalorder (!%p239_p2), %s1033_s30, 31  ;;  %v522_v4 = vld [vmem:[%s1561_s3] sm:$0xff] (!%p239_p2)  ;;  %v523_v5 = vld [vmem:[%s1561_s3 + $0x8] sm:$0xff] (!%p239_p2)  ;;  %vm308_vm1 = vcmask (!%p239_p2), 162816   ;;  %v524_v6 = vld [vmem:[%s1561_s3 + $0x10] sm:$0xff] (!%p239_p2) }
   0x7   : > { %v525_v7 = vld [vmem:[%s1561_s3 + $0x18] sm:$0xff] (!%p239_p2)  ;;  %v1272_v11 = vpack.c.bf16 (!%p239_p2), %v523_v5, %v522_v4  ;;  %v526_v14 = vld [vmem:[%s1561_s3 + $0x20] sm:$0xff] (!%p239_p2)  ;;  %v527_v15 = vld [vmem:[%s1561_s3 + $0x28] sm:$0xff] (!%p239_p2)  ;;  %vm537_vm2 = vcmask (!%p239_p2), 523264   ;;  %vm955_vm3 = vcmask (!%p239_p2), 277504  }
   0x8   : > { %1269 = vmatprep.subr.bf16.mxu0 (!%p239_p2), %v1268_v2  ;;  %1304 = vmatprep.subr.bf16.mxu1 (!%p239_p2), %v1268_v2  ;;  %v1276_v13 = vpack.c.bf16 (!%p239_p2), %v525_v7, %v524_v6  ;;  %v1280_v22 = vpack.c.bf16 (!%p239_p2), %v527_v15, %v526_v14  ;;  %v528_v29 = vld [vmem:[%s1561_s3 + $0x30] sm:$0xff] (!%p239_p2)  ;;  %v529_v30 = vld [vmem:[%s1561_s3 + $0x38] sm:$0xff] (!%p239_p2)  ;;  %v747_v32 = vld [vmem:[%s1563_s5] sm:$0xff] (!%p239_p2) }
   0x9   : > { %1271 = vmatpush3.bf16.msra.mxu0 (!%p239_p2), %v1268_v2  ;;  %1306 = vmatpush3.bf16.msra.mxu1 (!%p239_p2), %v1268_v2  ;;  %v1284_v31 = vpack.c.bf16 (!%p239_p2), %v529_v30, %v528_v29  ;;  %v748_v33 = vld [vmem:[%s1563_s5 + $0x8] sm:$0xff] (!%p239_p2)  ;;  %v749_v34 = vld [vmem:[%s1563_s5 + $0x10] sm:$0xff] (!%p239_p2)  ;;  %v750_v36 = vld [vmem:[%s1563_s5 + $0x18] sm:$0xff] (!%p239_p2) }
   0xa   : > { %1162 = vmatprep.subr.msk.mxu0 (!%p239_p2), %vm357_vm0, %v300_v3  ;;  %1305 = vmatprep.subr.msk.mxu1 (!%p239_p2), %vm357_vm0, %v300_v3  ;;  %v1288_v35 = vpack.c.bf16 (!%p239_p2), %v748_v33, %v747_v32  ;;  %v1292_v37 = vpack.c.bf16 (!%p239_p2), %v750_v36, %v749_v34  ;;  %v751_v38 = vld [vmem:[%s1563_s5 + $0x20] sm:$0xff] (!%p239_p2)  ;;  %v752_v39 = vld [vmem:[%s1563_s5 + $0x28] sm:$0xff] (!%p239_p2) }
   0xb   : > { %v1296_v40 = vpack.c.bf16 (!%p239_p2), %v752_v39, %v751_v38  ;;  %v1037_v41 = vld [vmem:[%s1560_s2] ss:$0 sm:$0xff] (!%p239_p2) }
   0xc   : > { %v1055_v29 = vld [vmem:[%s1562_s4] ss:$0 sm:$0xff] (!%p239_p2) }
   0xd   : > { %s1567_s30 = smov (!%p271_p3, %s1033_s30), 31  ;;  %1163 = vmatpush3.msk.msra.mxu0 %vm357_vm0, %v300_v3  ;;  %1307 = vmatpush3.msk.msra.mxu1 %vm357_vm0, %v300_v3 }
   0xe   : > { %s1034_s14 = sshll.u32 %s1567_s30, 3  ;;  %1273 = vmatprep.subr.bf16.mxu1 %v1272_v11  ;;  %1289 = vmatprep.subr.bf16.mxu0 %v1288_v35 }
   0xf   : > { %s1397_s17 = scalar_lea.vmem %s1558_s0, %s1034_s14  ;;  %s1521_s13 = scalar_lea.vmem %s1565_s7, %s1034_s14 }
  0x10   : > { %v282_v8 = vld [vmem:[%s1397_s17] sm:$0xff]  ;;  %v283_v9 = vld [vmem:[%s1397_s17 + $0x8] sm:$0xff]  ;;  %v284_v10 = vld [vmem:[%s1397_s17 + $0x10] sm:$0xff] }
  0x11   : > { %1164 = vmatprep.mubr.msk.f32.mxu0 %vm308_vm1, %v282_v8  ;;  %v290_v12 = vld [vmem:[%s1397_s17 + $0x40] sm:$0xff]  ;;  %v285_v16 = vld [vmem:[%s1397_s17 + $0x18] sm:$0xff]  ;;  %v291_v17 = vld [vmem:[%s1397_s17 + $0x48] sm:$0xff] }
  0x12   : > { %1165 = vmatmul.mubr.msk.f32.vlgmr.msra.gmra.mrb[0].mxu0 %vm308_vm1, %v283_v9  ;;  %1176 = vmatprep.mubr.msk.f32.mxu1 %vm308_vm1, %v290_v12  ;;  %v292_v18 = vld [vmem:[%s1397_s17 + $0x50] sm:$0xff]  ;;  %v286_v19 = vld [vmem:[%s1397_s17 + $0x20] sm:$0xff]  ;;  %v293_v20 = vld [vmem:[%s1397_s17 + $0x58] sm:$0xff] }
  0x13   : > { %1167 = vmatprep.mubr.msk.f32.mxu0 %vm308_vm1, %v284_v10  ;;  %1177 = vmatmul.mubr.msk.f32.vlgmr.msra.gmra.mrb[0].mxu1 %vm308_vm1, %v291_v17  ;;  %v294_v21 = vld [vmem:[%s1397_s17 + $0x60] sm:$0xff]  ;;  %v287_v23 = vld [vmem:[%s1397_s17 + $0x28] sm:$0xff]  ;;  %v288_v24 = vld [vmem:[%s1397_s17 + $0x30] sm:$0xff] }
  0x14   : > { %1179 = vmatprep.mubr.msk.f32.mxu1 %vm308_vm1, %v292_v18  ;;  %1275 = vmatpush3.bf16.msra.mxu1 %v1272_v11  ;;  %v295_v25 = vld [vmem:[%s1397_s17 + $0x68] sm:$0xff]  ;;  %v296_v26 = vld [vmem:[%s1397_s17 + $0x70] sm:$0xff]  ;;  %v289_v27 = vld [vmem:[%s1397_s17 + $0x38] sm:$0xff] }
  0x15   : > { %1277 = vmatprep.subr.bf16.mxu1 %v1276_v13  ;;  %v297_v28 = vld [vmem:[%s1397_s17 + $0x78] sm:$0xff]  ;;  %1291 = vmatpush3.bf16.msra.mxu0 %v1288_v35 }
  0x16   : > { %1168 = vmatmul.mubr.msk.f32.gmra.mrb[2].mxu0 %vm308_vm1, %v285_v16  ;;  %1293 = vmatprep.subr.bf16.mxu0 %v1292_v37 }
  0x17   : > { %1170 = vmatprep.mubr.msk.f32.mxu0 %vm308_vm1, %v286_v19  ;;  %1180 = vmatmul.mubr.msk.f32.gmra.mrb[2].mxu1 %vm308_vm1, %v293_v20 }
  0x18   : > { %1182 = vmatprep.mubr.msk.f32.mxu1 %vm308_vm1, %v294_v21  ;;  %1279 = vmatpush3.bf16.msra.mxu1 %v1276_v13 }
  0x19   : > { %1281 = vmatprep.subr.bf16.mxu1 %v1280_v22  ;;  %1295 = vmatpush3.bf16.msra.mxu0 %v1292_v37 }
  0x1a   : > { %1171 = vmatmul.mubr.msk.f32.gmra.mrb[4].mxu0 %vm308_vm1, %v287_v23  ;;  %1297 = vmatprep.subr.bf16.mxu0 %v1296_v40 }
  0x1b   : > { %1173 = vmatprep.mubr.msk.f32.mxu0 %vm308_vm1, %v288_v24  ;;  %1183 = vmatmul.mubr.msk.f32.gmra.mrb[4].mxu1 %vm308_vm1, %v295_v25 }
  0x1c   : > { %1185 = vmatprep.mubr.msk.f32.mxu1 %vm308_vm1, %v296_v26  ;;  %1283 = vmatpush3.bf16.msra.mxu1 %v1280_v22  ;;  %v753_v26 = vld [vmem:[%s1563_s5 + $0x30] sm:$0xff] }
  0x1d   : > { %1285 = vmatprep.subr.bf16.mxu1 %v1284_v31  ;;  %1299 = vmatpush3.bf16.msra.mxu0 %v1296_v40 }
  0x1e   : > { %1174 = vmatmul.mubr.msk.f32.gmra.mrb[6].mxu0 %vm308_vm1, %v289_v27  ;;  %v754_v27 = vld [vmem:[%s1563_s5 + $0x38] sm:$0xff] }
  0x1f   : > { %1186 = vmatmul.mubr.msk.f32.gmra.mrb[6].mxu1 %vm308_vm1, %v297_v28  ;;  %v1300_v28 = vpack.c.bf16 %v754_v27, %v753_v26 }
  0x20   : > { %1287 = vmatpush3.bf16.msra.mxu1 %v1284_v31 }
  0x21   : > { %1301 = vmatprep.subr.bf16.mxu0 %v1300_v28 }
  0x22   : > { %1303 = vmatpush3.bf16.msra.mxu0 %v1300_v28 }
  0xe5   : > { %v1166_v42 = vpop.f32.mrb[0].mxu0 }
  0xe6   : > { %v433_v43 = vadd.f32 %v1166_v42, %v1037_v41  ;;  %v427_v44 = vpop.f32.mrb[1].mxu0  ;;  %v1178_v46 = vpop.f32.mrb[0].mxu1 }
  0xe7   : > { %v428_v45 = vadd.f32 %v1037_v41, %v427_v44  ;;  %v467_v47 = vpop.f32.mrb[1].mxu1  ;;  %v473_v13 = vadd.f32 %v1178_v46, %v1037_v41 }
  0xe8   : > { %v507_v50 = vmax.f32 %v433_v43, 0.0  ;;  %v468_v2 = vadd.f32 %v1037_v41, %v467_v47 }
  0xe9   : > { %v506_v48 = vmax.f32 %v428_v45, 0.0  ;;  %v1169_v49 = vpop.f32.mrb[2].mxu0  ;;  %v515_v16 = vmax.f32 %v473_v13, 0.0 }
  0xea   : > { %v443_v51 = vadd.f32 %v1169_v49, %v1037_v41  ;;  %v437_v52 = vpop.f32.mrb[3].mxu0  ;;  %v1181_v54 = vpop.f32.mrb[2].mxu1  ;;  %v514_v10 = vmax.f32 %v468_v2, 0.0 }
  0xeb   : > { %v438_v53 = vadd.f32 %v1037_v41, %v437_v52  ;;  %1204 = vmatprep.mubr.msk.f32.mxu1 %vm537_vm2, %v506_v48  ;;  %v477_v55 = vpop.f32.mrb[3].mxu1  ;;  %v483_v17 = vadd.f32 %v1181_v54, %v1037_v41 }
  0xec   : > { %1205 = vmatmul.mubr.msk.f32.vlgmr.msra.gmra.mrb[8].mxu1 %vm537_vm2, %v507_v50  ;;  %v509_v58 = vmax.f32 %v443_v51, 0.0  ;;  %v478_v11 = vadd.f32 %v1037_v41, %v477_v55 }
  0xed   : > { %v508_v56 = vmax.f32 %v438_v53, 0.0  ;;  %v1172_v57 = vpop.f32.mrb[4].mxu0  ;;  %v517_v20 = vmax.f32 %v483_v17, 0.0 }
  0xee   : > { %v453_v59 = vadd.f32 %v1172_v57, %v1037_v41  ;;  %v447_v60 = vpop.f32.mrb[5].mxu0  ;;  %v1184_v62 = vpop.f32.mrb[4].mxu1  ;;  %v516_v14 = vmax.f32 %v478_v11, 0.0 }
  0xef   : > { %v448_v61 = vadd.f32 %v1037_v41, %v447_v60  ;;  %1207 = vmatprep.mubr.msk.f32.mxu1 %vm537_vm2, %v508_v56  ;;  %v487_v63 = vpop.f32.mrb[5].mxu1  ;;  %v493_v21 = vadd.f32 %v1184_v62, %v1037_v41 }
  0xf0   : > { %1208 = vmatmul.mubr.msk.f32.gmra.mrb[10].mxu1 %vm537_vm2, %v509_v58  ;;  %v511_v3 = vmax.f32 %v453_v59, 0.0  ;;  %v488_v15 = vadd.f32 %v1037_v41, %v487_v63 }
  0xf1   : > { %v510_v0 = vmax.f32 %v448_v61, 0.0  ;;  %v1175_v1 = vpop.f32.mrb[6].mxu0  ;;  %v519_v23 = vmax.f32 %v493_v21, 0.0 }
  0xf2   : > { %v463_v4 = vadd.f32 %v1175_v1, %v1037_v41  ;;  %v457_v5 = vpop.f32.mrb[7].mxu0  ;;  %v1187_v7 = vpop.f32.mrb[6].mxu1  ;;  %v518_v18 = vmax.f32 %v488_v15, 0.0 }
  0xf3   : > { %v458_v6 = vadd.f32 %v1037_v41, %v457_v5  ;;  %1210 = vmatprep.mubr.msk.f32.mxu1 %vm537_vm2, %v510_v0  ;;  %v497_v8 = vpop.f32.mrb[7].mxu1  ;;  %v503_v24 = vadd.f32 %v1187_v7, %v1037_v41 }
  0xf4   : > { %1211 = vmatmul.mubr.msk.f32.gmra.mrb[12].mxu1 %vm537_vm2, %v511_v3  ;;  %v513_v12 = vmax.f32 %v463_v4, 0.0  ;;  %v498_v19 = vadd.f32 %v1037_v41, %v497_v8 }
  0xf5   : > { %v512_v9 = vmax.f32 %v458_v6, 0.0  ;;  %v521_v25 = vmax.f32 %v503_v24, 0.0 }
  0xf6   : > { %v520_v22 = vmax.f32 %v498_v19, 0.0 }
  0xf7   : > { %1213 = vmatprep.mubr.msk.f32.mxu1 %vm537_vm2, %v512_v9 }
  0xf8   : > { %1214 = vmatmul.mubr.msk.f32.gmra.mrb[14].mxu1 %vm537_vm2, %v513_v12 }
  0xf9   : > { %1216 = vmatprep.mubr.msk.f32.mxu1 %vm537_vm2, %v514_v10 }
  0xfc   : > { %1217 = vmatmul.mubr.msk.f32.gmra.mrb[16].mxu1 %vm537_vm2, %v515_v16 }
  0xfd   : > { %1219 = vmatprep.mubr.msk.f32.mxu1 %vm537_vm2, %v516_v14  ;;  %v1072_v14 = vld [vmem:[%s1564_s6] ss:$0 sm:$0xff] }
 0x100   : > { %1220 = vmatmul.mubr.msk.f32.gmra.mrb[18].mxu1 %vm537_vm2, %v517_v20 }
 0x101   : > { %1222 = vmatprep.mubr.msk.f32.mxu1 %vm537_vm2, %v518_v18 }
 0x104   : > { %1223 = vmatmul.mubr.msk.f32.gmra.mrb[20].mxu1 %vm537_vm2, %v519_v23 }
 0x105   : > { %1225 = vmatprep.mubr.msk.f32.mxu1 %vm537_vm2, %v520_v22 }
 0x108   : > { %1226 = vmatmul.mubr.msk.f32.gmra.mrb[22].mxu1 %vm537_vm2, %v521_v25 }
 0x1bf   : > { %v1206_v30 = vpop.f32.mrb[8].mxu1 }
 0x1c0   : > { %v658_v31 = vadd.f32 %v1206_v30, %v1055_v29  ;;  %v652_v32 = vpop.f32.mrb[9].mxu1 }
 0x1c1   : > { %v653_v33 = vadd.f32 %v1055_v29, %v652_v32 }
 0x1c2   : > { %v732_v36 = vmax.f32 %v658_v31, 0.0 }
 0x1c3   : > { %v731_v34 = vmax.f32 %v653_v33, 0.0  ;;  %v1209_v35 = vpop.f32.mrb[10].mxu1 }
 0x1c4   : > { %v668_v37 = vadd.f32 %v1209_v35, %v1055_v29  ;;  %v662_v38 = vpop.f32.mrb[11].mxu1 }
 0x1c5   : > { %v663_v39 = vadd.f32 %v1055_v29, %v662_v38  ;;  %1244 = vmatprep.mubr.msk.f32.mxu0 %vm537_vm2, %v731_v34 }
 0x1c6   : > { %1245 = vmatmul.mubr.msk.f32.vlgmr.msra.gmra.mrb[8].mxu0 %vm537_vm2, %v732_v36  ;;  %v734_v42 = vmax.f32 %v668_v37, 0.0 }
 0x1c7   : > { %v733_v40 = vmax.f32 %v663_v39, 0.0  ;;  %v1212_v41 = vpop.f32.mrb[12].mxu1 }
 0x1c8   : > { %v678_v43 = vadd.f32 %v1212_v41, %v1055_v29  ;;  %v672_v44 = vpop.f32.mrb[13].mxu1 }
 0x1c9   : > { %v673_v45 = vadd.f32 %v1055_v29, %v672_v44  ;;  %1247 = vmatprep.mubr.msk.f32.mxu0 %vm537_vm2, %v733_v40 }
 0x1ca   : > { %1248 = vmatmul.mubr.msk.f32.gmra.mrb[10].mxu0 %vm537_vm2, %v734_v42  ;;  %v736_v48 = vmax.f32 %v678_v43, 0.0 }
 0x1cb   : > { %v735_v46 = vmax.f32 %v673_v45, 0.0  ;;  %v1215_v47 = vpop.f32.mrb[14].mxu1 }
 0x1cc   : > { %v688_v49 = vadd.f32 %v1215_v47, %v1055_v29  ;;  %v682_v50 = vpop.f32.mrb[15].mxu1 }
 0x1cd   : > { %v683_v51 = vadd.f32 %v1055_v29, %v682_v50  ;;  %1250 = vmatprep.mubr.msk.f32.mxu0 %vm537_vm2, %v735_v46 }
 0x1ce   : > { %1251 = vmatmul.mubr.msk.f32.gmra.mrb[12].mxu0 %vm537_vm2, %v736_v48  ;;  %v738_v54 = vmax.f32 %v688_v49, 0.0 }
 0x1cf   : > { %v737_v52 = vmax.f32 %v683_v51, 0.0  ;;  %v1218_v53 = vpop.f32.mrb[16].mxu1 }
 0x1d0   : > { %v698_v55 = vadd.f32 %v1218_v53, %v1055_v29  ;;  %v692_v56 = vpop.f32.mrb[17].mxu1 }
 0x1d1   : > { %v693_v57 = vadd.f32 %v1055_v29, %v692_v56  ;;  %1253 = vmatprep.mubr.msk.f32.mxu0 %vm537_vm2, %v737_v52 }
 0x1d2   : > { %1254 = vmatmul.mubr.msk.f32.gmra.mrb[14].mxu0 %vm537_vm2, %v738_v54  ;;  %v740_v60 = vmax.f32 %v698_v55, 0.0 }
 0x1d3   : > { %v739_v58 = vmax.f32 %v693_v57, 0.0  ;;  %v1221_v59 = vpop.f32.mrb[18].mxu1 }
 0x1d4   : > { %v708_v61 = vadd.f32 %v1221_v59, %v1055_v29  ;;  %v702_v62 = vpop.f32.mrb[19].mxu1 }
 0x1d5   : > { %v703_v63 = vadd.f32 %v1055_v29, %v702_v62  ;;  %1256 = vmatprep.mubr.msk.f32.mxu0 %vm537_vm2, %v739_v58 }
 0x1d6   : > { %1257 = vmatmul.mubr.msk.f32.gmra.mrb[16].mxu0 %vm537_vm2, %v740_v60  ;;  %v742_v2 = vmax.f32 %v708_v61, 0.0 }
 0x1d7   : > { %v741_v0 = vmax.f32 %v703_v63, 0.0  ;;  %v1224_v1 = vpop.f32.mrb[20].mxu1 }
 0x1d8   : > { %v718_v3 = vadd.f32 %v1224_v1, %v1055_v29  ;;  %v712_v4 = vpop.f32.mrb[21].mxu1 }
 0x1d9   : > { %v713_v5 = vadd.f32 %v1055_v29, %v712_v4  ;;  %1259 = vmatprep.mubr.msk.f32.mxu0 %vm537_vm2, %v741_v0 }
 0x1da   : > { %1260 = vmatmul.mubr.msk.f32.gmra.mrb[18].mxu0 %vm537_vm2, %v742_v2  ;;  %v744_v8 = vmax.f32 %v718_v3, 0.0 }
 0x1db   : > { %v743_v6 = vmax.f32 %v713_v5, 0.0  ;;  %v1227_v7 = vpop.f32.mrb[22].mxu1 }
 0x1dc   : > { %v728_v9 = vadd.f32 %v1227_v7, %v1055_v29  ;;  %v722_v10 = vpop.f32.mrb[23].mxu1 }
 0x1dd   : > { %v723_v11 = vadd.f32 %v1055_v29, %v722_v10  ;;  %1262 = vmatprep.mubr.msk.f32.mxu0 %vm537_vm2, %v743_v6 }
 0x1de   : > { %1263 = vmatmul.mubr.msk.f32.gmra.mrb[20].mxu0 %vm537_vm2, %v744_v8  ;;  %v746_v13 = vmax.f32 %v728_v9, 0.0 }
 0x1df   : > { %v745_v12 = vmax.f32 %v723_v11, 0.0 }
 0x1e1   : > { %1265 = vmatprep.mubr.msk.f32.mxu0 %vm537_vm2, %v745_v12 }
 0x1e2   : > { %1266 = vmatmul.mubr.msk.f32.gmra.mrb[22].mxu0 %vm537_vm2, %v746_v13 }
 0x299   : > { %v1246_v15 = vpop.f32.mrb[8].mxu0 }
 0x29a   : > { %v882_v16 = vadd.f32 %v1246_v15, %v1072_v14  ;;  %v876_v17 = vpop.f32.mrb[9].mxu0 }
 0x29b   : > { %v877_v18 = vadd.f32 %v1072_v14, %v876_v17 }
 0x29c   : > { %957 = vst.msk [vmem:[%s1521_s13 + $0x8] sm:$0xff] %vm955_vm3, %v882_v16 }
 0x29d   : > { %956 = vst.msk [vmem:[%s1521_s13] sm:$0xff] %vm955_vm3, %v877_v18  ;;  %v1249_v19 = vpop.f32.mrb[10].mxu0 }
 0x29e   : > { %v892_v20 = vadd.f32 %v1249_v19, %v1072_v14  ;;  %v886_v21 = vpop.f32.mrb[11].mxu0 }
 0x29f   : > { %v887_v22 = vadd.f32 %v1072_v14, %v886_v21 }
 0x2a0   : > { %959 = vst.msk [vmem:[%s1521_s13 + $0x18] sm:$0xff] %vm955_vm3, %v892_v20 }
 0x2a1   : > { %958 = vst.msk [vmem:[%s1521_s13 + $0x10] sm:$0xff] %vm955_vm3, %v887_v22  ;;  %v1252_v23 = vpop.f32.mrb[12].mxu0 }
 0x2a2   : > { %v902_v24 = vadd.f32 %v1252_v23, %v1072_v14  ;;  %v896_v25 = vpop.f32.mrb[13].mxu0 }
 0x2a3   : > { %v897_v26 = vadd.f32 %v1072_v14, %v896_v25 }
 0x2a4   : > { %961 = vst.msk [vmem:[%s1521_s13 + $0x28] sm:$0xff] %vm955_vm3, %v902_v24 }
 0x2a5   : > { %960 = vst.msk [vmem:[%s1521_s13 + $0x20] sm:$0xff] %vm955_vm3, %v897_v26  ;;  %v1255_v27 = vpop.f32.mrb[14].mxu0 }
 0x2a6   : > { %v912_v28 = vadd.f32 %v1255_v27, %v1072_v14  ;;  %v906_v29 = vpop.f32.mrb[15].mxu0 }
 0x2a7   : > { %v907_v30 = vadd.f32 %v1072_v14, %v906_v29 }
 0x2a8   : > { %963 = vst.msk [vmem:[%s1521_s13 + $0x38] sm:$0xff] %vm955_vm3, %v912_v28 }
 0x2a9   : > { %962 = vst.msk [vmem:[%s1521_s13 + $0x30] sm:$0xff] %vm955_vm3, %v907_v30  ;;  %v1258_v31 = vpop.f32.mrb[16].mxu0 }
 0x2aa   : > { %v922_v32 = vadd.f32 %v1258_v31, %v1072_v14  ;;  %v916_v33 = vpop.f32.mrb[17].mxu0 }
 0x2ab   : > { %v917_v34 = vadd.f32 %v1072_v14, %v916_v33 }
 0x2ac   : > { %965 = vst.msk [vmem:[%s1521_s13 + $0x48] sm:$0xff] %vm955_vm3, %v922_v32 }
 0x2ad   : > { %964 = vst.msk [vmem:[%s1521_s13 + $0x40] sm:$0xff] %vm955_vm3, %v917_v34  ;;  %v1261_v35 = vpop.f32.mrb[18].mxu0 }
 0x2ae   : > { %v932_v36 = vadd.f32 %v1261_v35, %v1072_v14  ;;  %v926_v37 = vpop.f32.mrb[19].mxu0 }
 0x2af   : > { %v927_v38 = vadd.f32 %v1072_v14, %v926_v37 }
 0x2b0   : > { %967 = vst.msk [vmem:[%s1521_s13 + $0x58] sm:$0xff] %vm955_vm3, %v932_v36 }
 0x2b1   : > { %966 = vst.msk [vmem:[%s1521_s13 + $0x50] sm:$0xff] %vm955_vm3, %v927_v38  ;;  %v1264_v39 = vpop.f32.mrb[20].mxu0 }
 0x2b2   : > { %v942_v40 = vadd.f32 %v1264_v39, %v1072_v14  ;;  %v936_v41 = vpop.f32.mrb[21].mxu0 }
 0x2b3   : > { %v937_v42 = vadd.f32 %v1072_v14, %v936_v41 }
 0x2b4   : > { %969 = vst.msk [vmem:[%s1521_s13 + $0x68] sm:$0xff] %vm955_vm3, %v942_v40 }
 0x2b5   : > { %968 = vst.msk [vmem:[%s1521_s13 + $0x60] sm:$0xff] %vm955_vm3, %v937_v42  ;;  %v1267_v43 = vpop.f32.mrb[22].mxu0 }
 0x2b6   : > { %v952_v44 = vadd.f32 %v1267_v43, %v1072_v14  ;;  %v946_v45 = vpop.f32.mrb[23].mxu0 }
 0x2b7   : > { %v947_v46 = vadd.f32 %v1072_v14, %v946_v45 }
 0x2b8   : > { %971 = vst.msk [vmem:[%s1521_s13 + $0x78] sm:$0xff] %vm955_vm3, %v952_v44 }
 0x2b9   : > { %970 = vst.msk [vmem:[%s1521_s13 + $0x70] sm:$0xff] %vm955_vm3, %v947_v46 }
 0x2ba PF: > { %s17_s24 = sadd.s32 1, %s1322_s24  }
 0x2bb   : > { %p14_p4 = scmp.ge.s32.totalorder %s17_s24, 4  }
 0x2bd   :  { %16 = sbr.rel (!%p14_p4) target bundleno = 1 (0x1), region = 78 }

</bundles_post_ra>
